<compile_context>
chip_gen: v7x
topology: tpu7x:2x2x1
jax: 0.10.0
libtpu: 0.0.40
codegen_flags: <defaults>
</compile_context>

<pallas_src>
import functools

import jax
import jax.numpy as jnp
from jax.experimental import pallas as pl
from jax.experimental.pallas import tpu as pltpu


def _round_up(x: int, m: int) -> int:
    return pl.cdiv(x, m) * m


def actor_kernel(x_ref, w1_ref, b1_ref, w2_ref, b2_ref, wh_ref, bh_ref,
                 lo_ref, hi_ref, out_ref, *, out_cols: int):
    # fc1 + ReLU (bf16 operands, f32 accumulate, f32 elementwise)
    h1 = jnp.dot(x_ref[...], w1_ref[...],
                 preferred_element_type=jnp.float32) + b1_ref[...]
    h1 = jnp.maximum(h1, 0.0).astype(jnp.bfloat16)

    # fc2 + ReLU
    h2 = jnp.dot(h1, w2_ref[...],
                 preferred_element_type=jnp.float32) + b2_ref[...]
    h2 = jnp.maximum(h2, 0.0).astype(jnp.bfloat16)

    # fused heads: columns [0, A) = mean, [A, 2A) = log_std, rest = zero pad
    head = jnp.dot(h2, wh_ref[...],
                   preferred_element_type=jnp.float32) + bh_ref[...]

    # Keep only the 2A useful columns and clamp with per-lane bounds:
    # mean lanes get (-inf, +inf) so they pass through, log_std lanes (-20, 2).
    head = head[:, :out_cols]
    out_ref[...] = jnp.minimum(jnp.maximum(head, lo_ref[...]), hi_ref[...])


def init_params(key, state_dim, action_dim, hidden_dim):
    """PyTorch-style init (uniform +/- 1/sqrt(fan_in)); weights stored [in, out]."""
    def linear(k, fan_in, fan_out):
        kw, kb = jax.random.split(k)
        bound = 1.0 / jnp.sqrt(jnp.float32(fan_in))
        w = jax.random.uniform(kw, (fan_in, fan_out), jnp.float32, -bound, bound)
        b = jax.random.uniform(kb, (1, fan_out), jnp.float32, -bound, bound)
        return w, b

    k1, k2, k3, k4 = jax.random.split(key, 4)
    w1, b1 = linear(k1, state_dim, hidden_dim)
    w2, b2 = linear(k2, hidden_dim, hidden_dim)
    wm, bm = linear(k3, hidden_dim, action_dim)
    wl, bl = linear(k4, hidden_dim, action_dim)
    return (w1, b1, w2, b2, wm, bm, wl, bl)


def prepare_params(params, action_dim):
    """One-time prep: fuse heads, pad hidden/head dims to 128 lanes, cast matmul
    weights to bf16 (biases stay f32), build per-lane clamp bound vectors."""
    w1, b1, w2, b2, wm, bm, wl, bl = params
    H = w1.shape[1]
    # NOTE: when hidden_dim is configurable, multiples of 256 best fill the
    # v6e/v7x MXU (128 maps natively on v5e).  Zero padding never changes math.
    Hp = _round_up(H, 128)
    head_pad = _round_up(2 * action_dim, 128)

    w1p = jnp.pad(w1, ((0, 0), (0, Hp - H))).astype(jnp.bfloat16)
    b1p = jnp.pad(b1, ((0, 0), (0, Hp - H))).astype(jnp.float32)
    w2p = jnp.pad(w2, ((0, Hp - H), (0, Hp - H))).astype(jnp.bfloat16)
    b2p = jnp.pad(b2, ((0, 0), (0, Hp - H))).astype(jnp.float32)

    wh = jnp.concatenate([wm, wl], axis=1)                        # [H, 2A]
    bh = jnp.concatenate([bm, bl], axis=1)                        # [1, 2A]
    whp = jnp.pad(wh, ((0, Hp - H), (0, head_pad - 2 * action_dim))).astype(jnp.bfloat16)
    bhp = jnp.pad(bh, ((0, 0), (0, head_pad - 2 * action_dim))).astype(jnp.float32)

    A = action_dim
    lo = jnp.concatenate([jnp.full((1, A), -jnp.inf, jnp.float32),
                          jnp.full((1, A), -20.0, jnp.float32)], axis=1)
    hi = jnp.concatenate([jnp.full((1, A), jnp.inf, jnp.float32),
                          jnp.full((1, A), 2.0, jnp.float32)], axis=1)
    return (w1p, b1p, w2p, b2p, whp, bhp, lo, hi)


def continuous_actor_forward(state, kernel_params, *, action_dim, batch_tile=1024):
    """state: [B, state_dim] f32. Returns (mean, log_std), each [B, action_dim] f32."""
    w1, b1, w2, b2, wh, bh, lo, hi = kernel_params
    B, S = state.shape
    Hp = w1.shape[1]
    head_pad = wh.shape[1]
    out_cols = 2 * action_dim

    # Remainder-friendly batch tiling: padding < 8 rows per block; large tile
    # amortizes the ~0.35 us per-grid-step overhead.
    n_blocks = pl.cdiv(B, batch_tile)
    if n_blocks == 1 and B >= 512:
        n_blocks = 2     # let multi-TensorCore parts shard the batch axis
    TB = _round_up(pl.cdiv(B, n_blocks), 8)
    Bp = n_blocks * TB

    x = state.astype(jnp.bfloat16)            # halve the input DMA bytes
    if Bp != B:
        x = jnp.pad(x, ((0, Bp - B), (0, 0)))

    # Generation-aware VMEM budget: actual need + headroom, capped below the
    # v7x 64 MiB physical per-TC VMEM.
    weight_bytes = sum(int(p.size) * p.dtype.itemsize
                       for p in (w1, b1, w2, b2, wh, bh, lo, hi))
    tile_bytes = 2 * (TB * S * 2 + TB * out_cols * 4)     # double-buffered I/O
    work_bytes = 6 * TB * Hp * 4                          # h1/h2/head headroom
    vmem_limit = int(max(16 << 20,
                         min(48 << 20,
                             2 * weight_bytes + tile_bytes + work_bytes + (4 << 20))))

    flops = 2 * Bp * (S * Hp + Hp * Hp + Hp * head_pad)
    bytes_accessed = int(Bp * S * 2 + weight_bytes + Bp * out_cols * 4)

    out = pl.pallas_call(
        functools.partial(actor_kernel, out_cols=out_cols),
        out_shape=jax.ShapeDtypeStruct((Bp, out_cols), jnp.float32),
        grid=(n_blocks,),
        in_specs=[
            pl.BlockSpec((TB, S), lambda i: (i, 0)),           # state tile (bf16)
            pl.BlockSpec((S, Hp), lambda i: (0, 0)),           # w1 (resident)
            pl.BlockSpec((1, Hp), lambda i: (0, 0)),           # b1
            pl.BlockSpec((Hp, Hp), lambda i: (0, 0)),          # w2
            pl.BlockSpec((1, Hp), lambda i: (0, 0)),           # b2
            pl.BlockSpec((Hp, head_pad), lambda i: (0, 0)),    # fused heads
            pl.BlockSpec((1, head_pad), lambda i: (0, 0)),     # fused head bias
            pl.BlockSpec((1, out_cols), lambda i: (0, 0)),     # clamp lower bounds
            pl.BlockSpec((1, out_cols), lambda i: (0, 0)),     # clamp upper bounds
        ],
        out_specs=pl.BlockSpec((TB, out_cols), lambda i: (i, 0)),
        compiler_params=pltpu.CompilerParams(
            dimension_semantics=("parallel",),
            vmem_limit_bytes=vmem_limit,
        ),
        cost_estimate=pl.CostEstimate(
            flops=flops, transcendentals=0, bytes_accessed=bytes_accessed),
    )(x, w1, b1, w2, b2, wh, bh, lo, hi)

    mean = out[:B, :action_dim]
    log_std = out[:B, action_dim:out_cols]
    return mean, log_std


def reference_forward(state, params):
    """Pure-JAX reference with the same bf16-operand / f32-accumulate dots."""
    w1, b1, w2, b2, wm, bm, wl, bl = params

    def bdot(a, w):
        return jnp.dot(a.astype(jnp.bfloat16), w.astype(jnp.bfloat16),
                       preferred_element_type=jnp.float32)

    h1 = jnp.maximum(bdot(state, w1) + b1, 0.0)
    h2 = jnp.maximum(bdot(h1, w2) + b2, 0.0)
    mean = bdot(h2, wm) + bm
    log_std = jnp.clip(bdot(h2, wl) + bl, -20.0, 2.0)
    return mean, log_std


if __name__ == "__main__":
    # Small shapes consistent with the module (hidden_dim = module default 256).
    B, state_dim, action_dim, hidden_dim = 8, 16, 4, 256

    key = jax.random.PRNGKey(0)
    k_params, k_state, k_state2 = jax.random.split(key, 3)
    params = init_params(k_params, state_dim, action_dim, hidden_dim)
    kernel_params = prepare_params(params, action_dim)

    # --- small-batch path (single grid step) -------------------------------
    state = jax.random.normal(k_state, (B, state_dim), jnp.float32)
    mean, log_std = continuous_actor_forward(state, kernel_params,
                                             action_dim=action_dim)
    jax.block_until_ready((mean, log_std))

    ref_mean, ref_log_std = reference_forward(state, params)
    assert mean.shape == (B, action_dim) and log_std.shape == (B, action_dim)
    assert jnp.allclose(mean, ref_mean, atol=5e-3, rtol=5e-3)
    assert jnp.allclose(log_std, ref_log_std, atol=5e-3, rtol=5e-3)
    assert jnp.all(log_std >= -20.0) and jnp.all(log_std <= 2.0)

    # --- multi-block path with a non-multiple batch (remainder tiling) -----
    B2 = 300
    state2 = jax.random.normal(k_state2, (B2, state_dim), jnp.float32)
    mean2, log_std2 = continuous_actor_forward(state2, kernel_params,
                                               action_dim=action_dim,
                                               batch_tile=128)
    jax.block_until_ready((mean2, log_std2))
    ref_mean2, ref_log_std2 = reference_forward(state2, params)
    assert mean2.shape == (B2, action_dim) and log_std2.shape == (B2, action_dim)
    assert jnp.allclose(mean2, ref_mean2, atol=5e-3, rtol=5e-3)
    assert jnp.allclose(log_std2, ref_log_std2, atol=5e-3, rtol=5e-3)
    assert jnp.all(log_std2 >= -20.0) and jnp.all(log_std2 <= 2.0)

    print("KERNEL_OK")
</pallas_src>

<mosaic_0001>
module attributes {stable_mosaic.version = 11 : i64} {
  func.func @actor_kernel(%arg0: i32, %arg1: memref<8x16xbf16, #tpu.memory_space<vmem>>, %arg2: memref<16x256xbf16, #tpu.memory_space<vmem>>, %arg3: memref<1x256xf32, #tpu.memory_space<vmem>>, %arg4: memref<256x256xbf16, #tpu.memory_space<vmem>>, %arg5: memref<1x256xf32, #tpu.memory_space<vmem>>, %arg6: memref<256x128xbf16, #tpu.memory_space<vmem>>, %arg7: memref<1x128xf32, #tpu.memory_space<vmem>>, %arg8: memref<1x8xf32, #tpu.memory_space<vmem>>, %arg9: memref<1x8xf32, #tpu.memory_space<vmem>>, %arg10: memref<8x8xf32, #tpu.memory_space<vmem>>) attributes {dimension_semantics = [#tpu.dimension_semantics<parallel>], iteration_bounds = array<i64: 1>, scalar_prefetch = 0 : i64, scratch_operands = 0 : i64, tpu.core_type = #tpu.core_type<tc>, window_params = [{transform_indices = @transform_0, window_bounds = array<i64: 8, 16>}, {pipeline_mode = #tpu.pipeline_mode<synchronous>, transform_indices = @transform_1, window_bounds = array<i64: 16, 256>}, {pipeline_mode = #tpu.pipeline_mode<synchronous>, transform_indices = @transform_2, window_bounds = array<i64: 1, 256>}, {pipeline_mode = #tpu.pipeline_mode<synchronous>, transform_indices = @transform_3, window_bounds = array<i64: 256, 256>}, {pipeline_mode = #tpu.pipeline_mode<synchronous>, transform_indices = @transform_4, window_bounds = array<i64: 1, 256>}, {pipeline_mode = #tpu.pipeline_mode<synchronous>, transform_indices = @transform_5, window_bounds = array<i64: 256, 128>}, {pipeline_mode = #tpu.pipeline_mode<synchronous>, transform_indices = @transform_6, window_bounds = array<i64: 1, 128>}, {pipeline_mode = #tpu.pipeline_mode<synchronous>, transform_indices = @transform_7, window_bounds = array<i64: 1, 8>}, {pipeline_mode = #tpu.pipeline_mode<synchronous>, transform_indices = @transform_8, window_bounds = array<i64: 1, 8>}, {transform_indices = @transform_9, window_bounds = array<i64: 8, 8>}]} {
    %c0 = arith.constant 0 : index
    %c0_0 = arith.constant 0 : index
    %0 = vector.load %arg1[%c0, %c0_0] : memref<8x16xbf16, #tpu.memory_space<vmem>>, vector<8x16xbf16>
    %c0_1 = arith.constant 0 : index
    %c0_2 = arith.constant 0 : index
    %1 = vector.load %arg2[%c0_1, %c0_2] : memref<16x256xbf16, #tpu.memory_space<vmem>>, vector<16x256xbf16>
    %cst = arith.constant dense<0.000000e+00> : vector<8x256xf32>
    %2 = tpu.matmul %0, %1, %cst {dimension_numbers = #tpu.dot_dimension_numbers<[1], [0], [0], [1], [0, 0, 1, 1], [], []>} : vector<8x16xbf16>, vector<16x256xbf16>, vector<8x256xf32> -> vector<8x256xf32>
    %c0_3 = arith.constant 0 : index
    %c0_4 = arith.constant 0 : index
    %3 = vector.load %arg3[%c0_3, %c0_4] : memref<1x256xf32, #tpu.memory_space<vmem>>, vector<1x256xf32>
    %4 = vector.broadcast %3 : vector<1x256xf32> to vector<8x256xf32>
    %5 = arith.addf %2, %4 : vector<8x256xf32>
    %cst_5 = arith.constant 0.000000e+00 : f32
    %6 = vector.broadcast %cst_5 : f32 to vector<8x256xf32>
    %7 = arith.maximumf %5, %6 : vector<8x256xf32>
    %8 = arith.truncf %7 : vector<8x256xf32> to vector<8x256xbf16>
    %c0_6 = arith.constant 0 : index
    %c0_7 = arith.constant 0 : index
    %9 = vector.load %arg4[%c0_6, %c0_7] : memref<256x256xbf16, #tpu.memory_space<vmem>>, vector<256x256xbf16>
    %cst_8 = arith.constant dense<0.000000e+00> : vector<8x256xf32>
    %10 = tpu.matmul %8, %9, %cst_8 {dimension_numbers = #tpu.dot_dimension_numbers<[1], [0], [0], [1], [0, 0, 1, 1], [], []>} : vector<8x256xbf16>, vector<256x256xbf16>, vector<8x256xf32> -> vector<8x256xf32>
    %c0_9 = arith.constant 0 : index
    %c0_10 = arith.constant 0 : index
    %11 = vector.load %arg5[%c0_9, %c0_10] : memref<1x256xf32, #tpu.memory_space<vmem>>, vector<1x256xf32>
    %12 = vector.broadcast %11 : vector<1x256xf32> to vector<8x256xf32>
    %13 = arith.addf %10, %12 : vector<8x256xf32>
    %cst_11 = arith.constant 0.000000e+00 : f32
    %14 = vector.broadcast %cst_11 : f32 to vector<8x256xf32>
    %15 = arith.maximumf %13, %14 : vector<8x256xf32>
    %16 = arith.truncf %15 : vector<8x256xf32> to vector<8x256xbf16>
    %c0_12 = arith.constant 0 : index
    %c0_13 = arith.constant 0 : index
    %17 = vector.load %arg6[%c0_12, %c0_13] : memref<256x128xbf16, #tpu.memory_space<vmem>>, vector<256x128xbf16>
    %cst_14 = arith.constant dense<0.000000e+00> : vector<8x128xf32>
    %18 = tpu.matmul %16, %17, %cst_14 {dimension_numbers = #tpu.dot_dimension_numbers<[1], [0], [0], [1], [0, 0, 1, 1], [], []>} : vector<8x256xbf16>, vector<256x128xbf16>, vector<8x128xf32> -> vector<8x128xf32>
    %c0_15 = arith.constant 0 : index
    %c0_16 = arith.constant 0 : index
    %19 = vector.load %arg7[%c0_15, %c0_16] : memref<1x128xf32, #tpu.memory_space<vmem>>, vector<1x128xf32>
    %20 = vector.broadcast %19 : vector<1x128xf32> to vector<8x128xf32>
    %21 = arith.addf %18, %20 : vector<8x128xf32>
    %22 = vector.extract_strided_slice %21 {offsets = [0, 0], sizes = [8, 8], strides = [1, 1]} : vector<8x128xf32> to vector<8x8xf32>
    %c0_17 = arith.constant 0 : index
    %c0_18 = arith.constant 0 : index
    %23 = vector.load %arg8[%c0_17, %c0_18] : memref<1x8xf32, #tpu.memory_space<vmem>>, vector<1x8xf32>
    %24 = vector.broadcast %23 : vector<1x8xf32> to vector<8x8xf32>
    %25 = arith.maximumf %22, %24 : vector<8x8xf32>
    %c0_19 = arith.constant 0 : index
    %c0_20 = arith.constant 0 : index
    %26 = vector.load %arg9[%c0_19, %c0_20] : memref<1x8xf32, #tpu.memory_space<vmem>>, vector<1x8xf32>
    %27 = vector.broadcast %26 : vector<1x8xf32> to vector<8x8xf32>
    %28 = arith.minimumf %25, %27 : vector<8x8xf32>
    %c0_21 = arith.constant 0 : index
    %c0_22 = arith.constant 0 : index
    %29 = vector.load %arg10[%c0_21, %c0_22] : memref<8x8xf32, #tpu.memory_space<vmem>>, vector<8x8xf32>
    tpu.vector_store %arg10[%c0_21, %c0_22], %28 {strides = array<i32>} : memref<8x8xf32, #tpu.memory_space<vmem>>, vector<8x8xf32>,
    return
  }
  func.func @transform_0(%arg0: i32) -> (i32, i32) {
    %c0_i32 = arith.constant 0 : i32
    %c0_i32_0 = arith.constant 0 : i32
    return %arg0, %c0_i32 : i32, i32
  }
  func.func @transform_1(%arg0: i32) -> (i32, i32) {
    %c0_i32 = arith.constant 0 : i32
    %c0_i32_0 = arith.constant 0 : i32
    %c0_i32_1 = arith.constant 0 : i32
    return %c0_i32, %c0_i32_0 : i32, i32
  }
  func.func @transform_2(%arg0: i32) -> (i32, i32) {
    %c0_i32 = arith.constant 0 : i32
    %c0_i32_0 = arith.constant 0 : i32
    %c0_i32_1 = arith.constant 0 : i32
    return %c0_i32, %c0_i32_0 : i32, i32
  }
  func.func @transform_3(%arg0: i32) -> (i32, i32) {
    %c0_i32 = arith.constant 0 : i32
    %c0_i32_0 = arith.constant 0 : i32
    %c0_i32_1 = arith.constant 0 : i32
    return %c0_i32, %c0_i32_0 : i32, i32
  }
  func.func @transform_4(%arg0: i32) -> (i32, i32) {
    %c0_i32 = arith.constant 0 : i32
    %c0_i32_0 = arith.constant 0 : i32
    %c0_i32_1 = arith.constant 0 : i32
    return %c0_i32, %c0_i32_0 : i32, i32
  }
  func.func @transform_5(%arg0: i32) -> (i32, i32) {
    %c0_i32 = arith.constant 0 : i32
    %c0_i32_0 = arith.constant 0 : i32
    %c0_i32_1 = arith.constant 0 : i32
    return %c0_i32, %c0_i32_0 : i32, i32
  }
  func.func @transform_6(%arg0: i32) -> (i32, i32) {
    %c0_i32 = arith.constant 0 : i32
    %c0_i32_0 = arith.constant 0 : i32
    %c0_i32_1 = arith.constant 0 : i32
    return %c0_i32, %c0_i32_0 : i32, i32
  }
  func.func @transform_7(%arg0: i32) -> (i32, i32) {
    %c0_i32 = arith.constant 0 : i32
    %c0_i32_0 = arith.constant 0 : i32
    %c0_i32_1 = arith.constant 0 : i32
    return %c0_i32, %c0_i32_0 : i32, i32
  }
  func.func @transform_8(%arg0: i32) -> (i32, i32) {
    %c0_i32 = arith.constant 0 : i32
    %c0_i32_0 = arith.constant 0 : i32
    %c0_i32_1 = arith.constant 0 : i32
    return %c0_i32, %c0_i32_0 : i32, i32
  }
  func.func @transform_9(%arg0: i32) -> (i32, i32) {
    %c0_i32 = arith.constant 0 : i32
    %c0_i32_0 = arith.constant 0 : i32
    return %arg0, %c0_i32 : i32, i32
  }
}

</mosaic_0001>

<bundles_post_ra>
// kernel: tpu_custom_call.1
= control target key start
LH: loop header
LB: loop body
LE: loop exit
PB: predicated region body
PF: predicated region fallthrough
CT: control target
= control target key end

     0   :  { %14 = vsyncpa [#allocation3], 0  ;;  %s1032_s0 = inlined_call_operand.hbm [shape: bf16[8,16], index: 0, kind: input, shape index: {}]   ;;  %s1033_s1 = inlined_call_operand.hbm [shape: bf16[16,256], index: 1, kind: input, shape index: {}]   ;;  %s1034_s2 = inlined_call_operand.vmem [shape: f32[1,256], index: 2, kind: input, shape index: {}]   ;;  %s1035_s3 = inlined_call_operand.hbm [shape: bf16[256,256], index: 3, kind: input, shape index: {}]   ;;  %s1036_s4 = inlined_call_operand.vmem [shape: f32[1,256], index: 4, kind: input, shape index: {}]   ;;  %s1037_s5 = inlined_call_operand.hbm [shape: bf16[256,128], index: 5, kind: input, shape index: {}]   ;;  %s1038_s6 = inlined_call_operand.vmem [shape: f32[1,128], index: 6, kind: input, shape index: {}]   ;;  %s1039_s7 = inlined_call_operand.vmem [shape: f32[1,8], index: 7, kind: input, shape index: {}]   ;;  %s1040_s8 = inlined_call_operand.vmem [shape: f32[1,8], index: 8, kind: input, shape index: {}]   ;;  %s1041_s9 = inlined_call_operand.hbm [shape: f32[8,8], index: 9, kind: output, shape index: {}]  }
   0x1   :  { %15 = vsyncpa [#allocation6], 0 }
   0x2   :  { %16 = vsyncpa [#allocation9], 0 }
   0x3   :  { %17 = vsyncpa [#allocation4], 0  ;;  %s891_s30 = smov [#allocation5]   ;;  %s773_s13 = scalar_lea.hbm %s1033_s1, 256 }
   0x4   :  { %s33_s10 = sshll.u32 %s891_s30, 4  ;;  %p774_p0 = scmp.ne.s32.totalorder %s1033_s1, %s773_s13  ;;  %s34_s10 = int_to_ptr.vmem [resolvable:$true] %s33_s10 }
   0x5   :  { %p777_p1 = scmp.lt.u32.totalorder %s773_s13, %s1033_s1 }
   0x7   :  { %p779_p2 = pnand %p777_p1, %p774_p0 }
   0x9   :  { %782 = shalt.err (!%p779_p2)
}
   0xa   :  { %s783_s18 = scalar_lea.vmem %s34_s10, 256  ;;  %p788_p4 = scmp.lt.s32.totalorder %s34_s10, %s34_s10 }
   0xb   :  { %p784_p3 = scmp.ne.s32.totalorder %s34_s10, %s783_s18  ;;  %p789_p5 = scmp.lt.s32.totalorder %s783_s18, %s783_s18 }
   0xd   :  { %p790_p6 = por %p789_p5, %p788_p4 }
   0xf   :  { %p791_p7 = pnand %p790_p6, %p784_p3 }
  0x11   :  { %794 = shalt.err (!%p791_p7)
}
  0x12   :  { %s892_s19 = smov 128   ;;  %s893_s20 = smov 8  }
  0x13   :  { %39 = dma.hbm_to_vmem [thread:$0]  %s1033_s1, 256, %s34_s10, [#allocation6], %s892_s19, %s892_s19, %s893_s20  }
  0x14   :  { %s894_s23 = smov [#allocation2]   ;;  %s895_s25 = smov [#allocation7]  }
  0x15   :  { %s24_s24 = sshll.u32 %s894_s23, 4  ;;  %s47_s26 = sshll.u32 %s895_s25, 4  ;;  %s25_s24 = int_to_ptr.vmem [resolvable:$true] %s24_s24  ;;  %s48_s26 = int_to_ptr.vmem [resolvable:$true] %s47_s26 }
  0x16   :  { %s795_s29 = scalar_lea.hbm %s1032_s0, 64 }
  0x17   :  { %p796_p8 = scmp.ne.s32.totalorder %s1032_s0, %s795_s29  ;;  %p799_p9 = scmp.lt.u32.totalorder %s795_s29, %s1032_s0 }
  0x19   :  { %p801_p10 = pnand %p799_p9, %p796_p8 }
  0x1b   :  { %804 = shalt.err (!%p801_p10)
}
  0x1c   :  { %s805_s1 = scalar_lea.vmem %s25_s24, 64  ;;  %p810_p12 = scmp.lt.s32.totalorder %s25_s24, %s25_s24 }
  0x1d   :  { %p806_p11 = scmp.ne.s32.totalorder %s25_s24, %s805_s1  ;;  %p811_p13 = scmp.lt.s32.totalorder %s805_s1, %s805_s1 }
  0x1f   :  { %p812_p0 = por %p811_p13, %p810_p12 }
  0x21   :  { %p813_p1 = pnand %p812_p0, %p806_p11 }
  0x23   :  { %816 = shalt.err (!%p813_p1)
}
  0x24   :  { %27 = dma.hbm_to_vmem [thread:$0]  %s1032_s0, 64, %s25_s24, [#allocation3]  }
  0x25   :  { %s817_s17 = scalar_lea.hbm %s1035_s3, 4096 }
  0x26   :  { %p818_p2 = scmp.ne.s32.totalorder %s1035_s3, %s817_s17  ;;  %p821_p3 = scmp.lt.u32.totalorder %s817_s17, %s1035_s3 }
  0x28   :  { %p823_p4 = pnand %p821_p3, %p818_p2 }
  0x2a   :  { %826 = shalt.err (!%p823_p4)
}
  0x2b   :  { %s827_s25 = scalar_lea.vmem %s48_s26, 4096  ;;  %p832_p6 = scmp.lt.s32.totalorder %s48_s26, %s48_s26 }
  0x2c   :  { %p828_p5 = scmp.ne.s32.totalorder %s48_s26, %s827_s25  ;;  %p833_p7 = scmp.lt.s32.totalorder %s827_s25, %s827_s25 }
  0x2e   :  { %p834_p8 = por %p833_p7, %p832_p6 }
  0x30   :  { %p835_p9 = pnand %p834_p8, %p828_p5 }
  0x32   :  { %838 = shalt.err (!%p835_p9)
}
  0x33   :  { %53 = dma.hbm_to_vmem [thread:$0]  %s1035_s3, 4096, %s48_s26, [#allocation6], %s892_s19, %s892_s19, %s893_s20  }
  0x34   :  { %s896_s27 = smov [#allocation8]   ;;  %s839_s11 = scalar_lea.hbm %s1037_s5, 2048 }
  0x35   :  { %s61_s28 = sshll.u32 %s896_s27, 4  ;;  %p840_p10 = scmp.ne.s32.totalorder %s1037_s5, %s839_s11  ;;  %s62_s28 = int_to_ptr.vmem [resolvable:$true] %s61_s28 }
  0x36   :  { %p843_p11 = scmp.lt.u32.totalorder %s839_s11, %s1037_s5 }
  0x38   :  { %p845_p12 = pnand %p843_p11, %p840_p10 }
  0x3a   :  { %848 = shalt.err (!%p845_p12)
}
  0x3b   :  { %s849_s14 = scalar_lea.vmem %s62_s28, 2048  ;;  %p854_p0 = scmp.lt.s32.totalorder %s62_s28, %s62_s28 }
  0x3c   :  { %p850_p13 = scmp.ne.s32.totalorder %s62_s28, %s849_s14  ;;  %p855_p1 = scmp.lt.s32.totalorder %s849_s14, %s849_s14 }
  0x3e   :  { %p856_p2 = por %p855_p1, %p854_p0 }
  0x40   :  { %p857_p3 = pnand %p856_p2, %p850_p13 }
  0x42   :  { %860 = shalt.err (!%p857_p3)
}
  0x43   :  { %s897_s3 = smov 64   ;;  %s898_s19 = smov 4  }
  0x44   :  { %67 = dma.hbm_to_vmem [thread:$0]  %s1037_s5, 2048, %s62_s28, [#allocation9], %s897_s3, %s897_s3, %s898_s19  }
  0x45   :  { %883 = dma.done.wait [#allocation3], 64  }
  0x46   :  { %884 = vsyncadd [#allocation3], 4294967232 }
  0x47   :  { %885 = dma.done.wait [#allocation6], 4352  }
  0x48   :  { %886 = vsyncadd [#allocation6], 4294962944 }
  0x49   :  { %887 = dma.done.wait [#allocation9], 2048  }
  0x4a   :  { %888 = vsyncadd [#allocation9], 4294965248  ;;  %v899_v0 = vmov 0   ;;  %v706_v1 = vld [vmem:[#allocation5 + $0x4] ss:$8 sps:$4 sm:$0xff]   ;;  %vm112_vm0 = vcmask 130048   ;;  %v92_v48 = vlaneseq }
  0x4b   :  { %148 = vmatprep.mubr.bf16.mxu0 %v899_v0  ;;  %v708_v2 = vld [vmem:[#allocation5] ss:$8 sps:$4 sm:$0xff]   ;;  %v87_v3 = vld [vmem:[#allocation2] sm:$0xf]  ;;  %116 = vmatprep.subr.bf16.mxu0 %v706_v1  ;;  %v711_v5 = vld [vmem:[#allocation7] ss:$8 sps:$4 sm:$0xff]  }
  0x4c   :  { %v709_v4 = vld [vmem:[#allocation7 + $0x4] ss:$8 sps:$4 sm:$0xff]   ;;  %117 = vmatpush1.bf16.msra.mxu0 %v708_v2  ;;  %v712_v6 = vld [vmem:[#allocation7 + $0x14] ss:$8 sps:$4 sm:$0xff]   ;;  %v714_v7 = vld [vmem:[#allocation7 + $0x10] ss:$8 sps:$4 sm:$0xff]  }
  0x4d   :  { %365 = vmatprep.subr.bf16.mxu1 %v709_v4  ;;  %v715_v8 = vld [vmem:[#allocation7 + $0x24] ss:$8 sps:$4 sm:$0xff]   ;;  %v717_v9 = vld [vmem:[#allocation7 + $0x20] ss:$8 sps:$4 sm:$0xff]   ;;  %v718_v10 = vld [vmem:[#allocation7 + $0x34] ss:$8 sps:$4 sm:$0xff]  }
  0x4e   :  { %366 = vmatpush1.bf16.msra.mxu1 %v711_v5  ;;  %v720_v11 = vld [vmem:[#allocation7 + $0x30] ss:$8 sps:$4 sm:$0xff]   ;;  %v721_v12 = vld [vmem:[#allocation7 + $0x44] ss:$8 sps:$4 sm:$0xff]   ;;  %v723_v13 = vld [vmem:[#allocation7 + $0x40] ss:$8 sps:$4 sm:$0xff]  }
  0x4f   :  { %622 = vmatmul.mubr.msk.bf16.vlgmr.msra.gmra.mrb[0].mxu0 %vm112_vm0, %v87_v3  ;;  %367 = vmatprep.subr.bf16.mxu1 %v712_v6  ;;  %v724_v14 = vld [vmem:[#allocation7 + $0x54] ss:$8 sps:$4 sm:$0xff]   ;;  %v726_v15 = vld [vmem:[#allocation7 + $0x50] ss:$8 sps:$4 sm:$0xff]   ;;  %v727_v16 = vld [vmem:[#allocation7 + $0x64] ss:$8 sps:$4 sm:$0xff]  }
  0x50   :  { %v729_v17 = vld [vmem:[#allocation7 + $0x60] ss:$8 sps:$4 sm:$0xff]   ;;  %v730_v18 = vld [vmem:[#allocation7 + $0x74] ss:$8 sps:$4 sm:$0xff]   ;;  %v732_v19 = vld [vmem:[#allocation7 + $0x70] ss:$8 sps:$4 sm:$0xff]  }
  0x51   :  { %v733_v20 = vld [vmem:[#allocation7 + $0x84] ss:$8 sps:$4 sm:$0xff]   ;;  %v735_v21 = vld [vmem:[#allocation7 + $0x80] ss:$8 sps:$4 sm:$0xff]   ;;  %v736_v22 = vld [vmem:[#allocation7 + $0x94] ss:$8 sps:$4 sm:$0xff]  }
  0x52   :  { %368 = vmatpush1.bf16.msra.mxu1 %v714_v7  ;;  %v738_v23 = vld [vmem:[#allocation7 + $0x90] ss:$8 sps:$4 sm:$0xff]   ;;  %v739_v24 = vld [vmem:[#allocation7 + $0xa4] ss:$8 sps:$4 sm:$0xff]   ;;  %v741_v25 = vld [vmem:[#allocation7 + $0xa0] ss:$8 sps:$4 sm:$0xff]  }
  0x53   :  { %369 = vmatprep.subr.bf16.mxu1 %v715_v8  ;;  %v742_v26 = vld [vmem:[#allocation7 + $0xb4] ss:$8 sps:$4 sm:$0xff]   ;;  %v744_v27 = vld [vmem:[#allocation7 + $0xb0] ss:$8 sps:$4 sm:$0xff]   ;;  %v745_v28 = vld [vmem:[#allocation7 + $0xc4] ss:$8 sps:$4 sm:$0xff]  }
  0x54   :  { %v747_v29 = vld [vmem:[#allocation7 + $0xc0] ss:$8 sps:$4 sm:$0xff]   ;;  %v748_v30 = vld [vmem:[#allocation7 + $0xd4] ss:$8 sps:$4 sm:$0xff]   ;;  %v750_v31 = vld [vmem:[#allocation7 + $0xd0] ss:$8 sps:$4 sm:$0xff]  }
  0x55   :  { %v751_v32 = vld [vmem:[#allocation7 + $0xe4] ss:$8 sps:$4 sm:$0xff]   ;;  %v753_v33 = vld [vmem:[#allocation7 + $0xe0] ss:$8 sps:$4 sm:$0xff]   ;;  %v754_v34 = vld [vmem:[#allocation7 + $0xf4] ss:$8 sps:$4 sm:$0xff]  }
  0x56   :  { %370 = vmatpush1.bf16.msra.mxu1 %v717_v9  ;;  %v756_v35 = vld [vmem:[#allocation7 + $0xf0] ss:$8 sps:$4 sm:$0xff]   ;;  %v757_v36 = vld [vmem:[#allocation8 + $0x40] sm:$0xff]   ;;  %v759_v38 = vld [vmem:[#allocation8 + $0x48] sm:$0xff]   ;;  %v93_v49 = vshrl.u32 %v92_v48, 7  ;;  %s900_s25 = smov [#allocation10]  }
  0x57   :  { %371 = vmatprep.subr.bf16.mxu1 %v718_v10  ;;  %v758_v37 = vld [vmem:[#allocation8] sm:$0xff]   ;;  %674 = vmatprep.subr.bf16.mxu0 %v757_v36  ;;  %v760_v39 = vld [vmem:[#allocation8 + $0x8] sm:$0xff]   ;;  %v761_v40 = vld [vmem:[#allocation8 + $0x50] sm:$0xff]   ;;  %s609_s0 = sshll.u32 %s900_s25, 4  ;;  %vm601_vm1 = vcmask 64512   ;;  %s610_s0 = int_to_ptr.vmem [resolvable:$true] %s609_s0 }
  0x58   :  { %675 = vmatpush3.bf16.msra.mxu0 %v758_v37  ;;  %v762_v41 = vld [vmem:[#allocation8 + $0x10] sm:$0xff]   ;;  %v763_v42 = vld [vmem:[#allocation8 + $0x58] sm:$0xff]   ;;  %v765_v44 = vld [vmem:[#allocation8 + $0x60] sm:$0xff]   ;;  %v94_v50 = vsub.s32 0, %v93_v49  ;;  %v98_v52 = vsub.s32 1, %v93_v49  ;;  %p866_p5 = scmp.lt.s32.totalorder %s610_s0, %s610_s0 }
  0x59   :  { %676 = vmatprep.subr.bf16.mxu0 %v759_v38  ;;  %v764_v43 = vld [vmem:[#allocation8 + $0x18] sm:$0xff]   ;;  %v766_v45 = vld [vmem:[#allocation8 + $0x20] sm:$0xff]   ;;  %v767_v46 = vld [vmem:[#allocation8 + $0x68] sm:$0xff]  }
  0x5a   :  { %372 = vmatpush1.bf16.msra.mxu1 %v720_v11  ;;  %v768_v47 = vld [vmem:[#allocation8 + $0x28] sm:$0xff]   ;;  %v769_v1 = vld [vmem:[#allocation8 + $0x70] sm:$0xff]   ;;  %v771_v3 = vld [vmem:[#allocation8 + $0x78] sm:$0xff]  }
  0x5b   :  { %373 = vmatprep.subr.bf16.mxu1 %v721_v12  ;;  %v90_v51 = vld [vmem:[%s1034_s2] sm:$0x3]  ;;  %v770_v2 = vld [vmem:[#allocation8 + $0x30] sm:$0xff]   ;;  %v772_v4 = vld [vmem:[#allocation8 + $0x38] sm:$0xff]  }
  0x5c   :  { %677 = vmatpush3.bf16.msra.mxu0 %v760_v39  ;;  %v95_v53 = vrot.slane %v90_v51, %v94_v50  ;;  %v99_v54 = vrot.slane %v90_v51, %v98_v52  ;;  %v193_v5 = vld [vmem:[%s1036_s4] sm:$0x3] }
  0x5d   :  { %678 = vmatprep.subr.bf16.mxu0 %v761_v40  ;;  %v198_v6 = vrot.slane %v193_v5, %v94_v50  ;;  %v202_v7 = vrot.slane %v193_v5, %v98_v52 }
  0x5e   :  { %374 = vmatpush1.bf16.msra.mxu1 %v723_v13 }
  0x5f   :  { %375 = vmatprep.subr.bf16.mxu1 %v724_v14 }
  0x60   :  { %679 = vmatpush3.bf16.msra.mxu0 %v762_v41 }
  0x61   :  { %680 = vmatprep.subr.bf16.mxu0 %v763_v42 }
  0x62   :  { %376 = vmatpush1.bf16.msra.mxu1 %v726_v15 }
  0x63   :  { %377 = vmatprep.subr.bf16.mxu1 %v727_v16 }
  0x64   :  { %681 = vmatpush3.bf16.msra.mxu0 %v764_v43 }
  0x65   :  { %682 = vmatprep.subr.bf16.mxu0 %v765_v44 }
  0x66   :  { %378 = vmatpush1.bf16.msra.mxu1 %v729_v17 }
  0x67   :  { %379 = vmatprep.subr.bf16.mxu1 %v730_v18 }
  0x68   :  { %683 = vmatpush3.bf16.msra.mxu0 %v766_v45 }
  0x69   :  { %684 = vmatprep.subr.bf16.mxu0 %v767_v46 }
  0x6a   :  { %380 = vmatpush1.bf16.msra.mxu1 %v732_v19  ;;  %v655_v19 = vld [vmem:[%s1038_s6] ss:$0 sm:$0xff]  ;;  %s861_s6 = scalar_lea.vmem %s610_s0, 128 }
  0x6b   :  { %381 = vmatprep.subr.bf16.mxu1 %v733_v20  ;;  %p862_p4 = scmp.ne.s32.totalorder %s610_s0, %s861_s6  ;;  %p867_p6 = scmp.lt.s32.totalorder %s861_s6, %s861_s6 }
  0x6c   :  { %685 = vmatpush3.bf16.msra.mxu0 %v768_v47 }
  0x6d   :  { %686 = vmatprep.subr.bf16.mxu0 %v769_v1  ;;  %p868_p7 = por %p867_p6, %p866_p5 }
  0x6e   :  { %382 = vmatpush1.bf16.msra.mxu1 %v735_v21 }
  0x6f   :  { %383 = vmatprep.subr.bf16.mxu1 %v736_v22  ;;  %p869_p8 = pnand %p868_p7, %p862_p4 }
  0x70   :  { %687 = vmatpush3.bf16.msra.mxu0 %v770_v2 }
  0x71   :  { %688 = vmatprep.subr.bf16.mxu0 %v771_v3 }
  0x72   :  { %384 = vmatpush1.bf16.msra.mxu1 %v738_v23  ;;  %v672_v23 = vld [vmem:[%s1039_s7] ss:$0 sm:$0xff] }
  0x73   :  { %385 = vmatprep.subr.bf16.mxu1 %v739_v24 }
  0x74   :  { %689 = vmatpush3.bf16.msra.mxu0 %v772_v4 }
  0x76   :  { %386 = vmatpush1.bf16.msra.mxu1 %v741_v25 }
  0x77   :  { %387 = vmatprep.subr.bf16.mxu1 %v742_v26  ;;  %v673_v26 = vld [vmem:[%s1040_s8] ss:$0 sm:$0xff] }
  0x7a   :  { %388 = vmatpush1.bf16.msra.mxu1 %v744_v27 }
  0x7b   :  { %389 = vmatprep.subr.bf16.mxu1 %v745_v28 }
  0x7e   :  { %390 = vmatpush1.bf16.msra.mxu1 %v747_v29 }
  0x7f   :  { %391 = vmatprep.subr.bf16.mxu1 %v748_v30 }
  0x82   :  { %392 = vmatpush1.bf16.msra.mxu1 %v750_v31 }
  0x83   :  { %393 = vmatprep.subr.bf16.mxu1 %v751_v32 }
  0x86   :  { %394 = vmatpush1.bf16.msra.mxu1 %v753_v33 }
  0x87   :  { %395 = vmatprep.subr.bf16.mxu1 %v754_v34 }
  0x8a   :  { %396 = vmatpush1.bf16.msra.mxu1 %v756_v35 }
 0x122   :  { %v150_v55 = vpop.f32.mrb[0].mxu0 }
 0x123   :  { %v151_v56 = vadd.f32 %v150_v55, %v95_v53  ;;  %v152_v57 = vpop.f32.mrb[1].mxu0 }
 0x124   :  { %v153_v58 = vadd.f32 %v152_v57, %v99_v54  ;;  %v154_v59 = vpop.f32.mrb[2].mxu0 }
 0x125   :  { %v157_v60 = vmax.f32 %v151_v56, 0.0  ;;  %v155_v61 = vpop.f32.mrb[3].mxu0 }
 0x126   :  { %v158_v62 = vmax.f32 %v153_v58, 0.0 }
 0x127   :  { %v159_v0 = vpack.c.bf16 %v157_v60, %v157_v60 }
 0x128   :  { %v160_v63 = vpack.c.bf16 %v158_v62, %v158_v62 }
 0x12a   :  { %397 = vmatprep.mubr.bf16.mxu1 %v160_v63 }
 0x12b   :  { %398 = vmatmul.mubr.bf16.vlgmr.msra.gmra.mrb[0].mxu1 %v159_v0 }
 0x1fe   :  { %v399_v8 = vpop.f32.mrb[0].mxu1 }
 0x1ff   :  { %v400_v9 = vadd.f32 %v399_v8, %v198_v6  ;;  %v401_v10 = vpop.f32.mrb[1].mxu1 }
 0x200   :  { %v402_v11 = vadd.f32 %v401_v10, %v202_v7  ;;  %v403_v12 = vpop.f32.mrb[2].mxu1 }
 0x201   :  { %v406_v13 = vmax.f32 %v400_v9, 0.0  ;;  %v404_v14 = vpop.f32.mrb[3].mxu1 }
 0x202   :  { %v407_v15 = vmax.f32 %v402_v11, 0.0 }
 0x203   :  { %v408_v17 = vpack.c.bf16 %v406_v13, %v406_v13 }
 0x204   :  { %v409_v16 = vpack.c.bf16 %v407_v15, %v407_v15 }
 0x206   :  { %577 = vmatprep.mubr.bf16.mxu0 %v409_v16 }
 0x207   :  { %578 = vmatmul.mubr.bf16.vlgmr.msra.gmra.mrb[4].mxu0 %v408_v17 }
 0x2da   :  { %v690_v18 = vpop.f32.mrb[4].mxu0 }
 0x2db   :  { %v691_v20 = vpop.f32.mrb[5].mxu0 }
 0x2dc   :  { %v692_v21 = vadd.f32 %v691_v20, %v690_v18  ;;  %v693_v22 = vpop.f32.mrb[6].mxu0 }
 0x2dd   :  { %v694_v24 = vpop.f32.mrb[7].mxu0 }
 0x2de   :  { %v580_v25 = vadd.f32 %v692_v21, %v655_v19 }
 0x2e0   :  { %v592_v27 = vmax.f32 %v580_v25, %v672_v23 }
 0x2e2   :  { %v600_v28 = vmin.f32 %v592_v27, %v673_v26 }
 0x2e4   :  { %602 = vst.msk [vmem:[#allocation10] sm:$0xff] %vm601_vm1, %v600_v28 }
 0x2e5   :  { %872 = shalt.err (!%p869_p8)
}
 0x2e6   :  { %s873_s27 = scalar_lea.hbm %s1041_s9, 128 }
 0x2e7   :  { %p874_p9 = scmp.ne.s32.totalorder %s1041_s9, %s873_s27  ;;  %p877_p10 = scmp.lt.u32.totalorder %s873_s27, %s1041_s9 }
 0x2e9   :  { %p879_p11 = pnand %p877_p10, %p874_p9 }
 0x2eb   :  { %882 = shalt.err (!%p879_p11)
}
 0x2ec   :  { %612 = dma.vmem_to_hbm [thread:$0]  %s610_s0, 128, %s1041_s9, [#allocation4]  }
 0x2ed   :  { %889 = dma.done.wait [#allocation4], 128  }
 0x2ee   :  { %890 = vsyncadd [#allocation4], 4294967168 }
 0x2ef   :  { %616 = vsyncpa [#allocation3], 1 }
 0x2f0   :  { %617 = vsyncpa [#allocation6], 1 }
 0x2f1   :  { %618 = vsyncpa [#allocation9], 1 }
 0x2f2   :  { %619 = vsyncpa [#allocation4], 1 }

</bundles_post_ra>
